<compile_context>
chip_gen: v5e
topology: v5e:2x2
jax: 0.10.0
libtpu: 0.0.40
codegen_flags: <defaults>
</compile_context>

<pallas_src>
import jax
import jax.numpy as jnp
from jax.experimental import pallas as pl
from jax.experimental.pallas import tpu as pltpu

_MIB = 1024 * 1024
# Keep the resident VMEM footprint comfortably under v7x's 64 MiB per-TensorCore
# budget (v5e/v6e have 128 MiB physical, so this is safe everywhere).
_VMEM_BUDGET = 40 * _MIB


def _round_up(v, m):
    return ((v + m - 1) // m) * m


def _pick_tile(dim, max_tile, step):
    """Largest multiple of `step` (<= max_tile) that evenly divides `dim`.

    Falls back to the capped max tile (caller pads `dim` up to a multiple) if
    nothing divides — zero-padding the reduction axis is exact, and M/N padding
    is sliced off the output.
    """
    cap = max(step, (max_tile // step) * step)
    t = cap
    while t >= step:
        if dim % t == 0:
            return t
        t -= step
    return cap


def _mlp_kernel_single_k(x_ref, w_ref, b_ref, o_ref):
    """Fused Linear + bias + ReLU when the whole K dimension fits in one tile."""
    out = jnp.dot(x_ref[...], w_ref[...], preferred_element_type=jnp.float32)
    out = out + b_ref[...].astype(jnp.float32)
    # Dropout with p=0.0 (module default) is the identity.
    # TODO(synk): training-mode dropout (p>0) would build a keep-mask here with
    #             pltpu.prng_seed + pltpu.prng_random_bits.
    o_ref[...] = jnp.maximum(out, 0.0).astype(o_ref.dtype)


def _mlp_kernel_multi_k(x_ref, w_ref, b_ref, o_ref, acc_ref):
    """K-tiled matmul with f32 VMEM accumulator; bias+ReLU applied once at the end."""
    k = pl.program_id(2)

    @pl.when(k == 0)
    def _init():
        acc_ref[...] = jnp.zeros_like(acc_ref)

    acc_ref[...] += jnp.dot(x_ref[...], w_ref[...], preferred_element_type=jnp.float32)

    @pl.when(k == pl.num_programs(2) - 1)
    def _finalize():
        out = acc_ref[...] + b_ref[...].astype(jnp.float32)
        o_ref[...] = jnp.maximum(out, 0.0).astype(o_ref.dtype)


def mlp_forward(x, weight, bias, *, compute_in_bf16=False, out_dtype=None,
                weight_buffers=3):
    """MLP forward pass.

    x: (B, D_in); weight: (D_in, D_out) (transpose of PyTorch's (out, in) layout);
    bias: (D_out,). Returns (B, D_out).
    """
    B, D_in = x.shape
    assert weight.shape[0] == D_in
    D_out = weight.shape[1]

    out_dtype = x.dtype if out_dtype is None else jnp.dtype(out_dtype)
    in_dtype = jnp.bfloat16 if compute_in_bf16 else x.dtype
    in_bytes = jnp.dtype(in_dtype).itemsize
    out_bytes = jnp.dtype(out_dtype).itemsize
    sublane = 16 if in_bytes == 2 else 8  # bf16 vregs pack (16, 128)

    # --------------------------- tile selection ---------------------------
    Bp0 = _round_up(B, sublane)
    D_in_p0 = _round_up(D_in, 128)
    D_out_p0 = _round_up(D_out, 128)

    # tm: keep the whole batch resident when it fits (weight matrix then streams
    # from HBM exactly once); otherwise use 128-multiple row tiles up to 512.
    tm = Bp0 if Bp0 <= 512 else _pick_tile(Bp0, 512, 128)

    # tk: biggest reduction tile (fewest accumulator passes), lane-aligned.
    tk_cap = 1024 if in_bytes == 2 else 512
    tk = D_in_p0 if D_in_p0 <= tk_cap else _pick_tile(D_in_p0, tk_cap, 128)

    # tn: wide (ideally >=256, MXU-matched on v6e/v7x), lane-dense output tiles.
    tn = D_out_p0 if D_out_p0 <= 512 else _pick_tile(D_out_p0, 512, 128)

    # v7x has 2 TensorCores fed through the "parallel" grid axes: if the whole
    # batch is one row tile and D_out is large, split N so the second core works.
    if tm >= Bp0 and tn == D_out_p0 and D_out_p0 >= 512:
        tn = _pick_tile(D_out_p0 // 2, 512, 128)

    # --------------------------- VMEM budgeting ---------------------------
    def _footprint(tm_, tn_, tk_, w_bufs_):
        multi_k_ = _round_up(D_in, tk_) // tk_ > 1
        return (2 * tm_ * tk_ * in_bytes          # x tiles (double buffered)
                + w_bufs_ * tk_ * tn_ * in_bytes  # weight stream buffers
                + 2 * tn_ * 4                     # bias
                + 2 * tm_ * tn_ * out_bytes       # output tiles (double buffered)
                + (tm_ * tn_ * 4 if multi_k_ else 0))  # f32 accumulator scratch

    w_bufs_for_budget = max(2, weight_buffers)
    while _footprint(tm, tn, tk, w_bufs_for_budget) > _VMEM_BUDGET:
        if tk > 256:
            tk = max(128, (tk // 2) // 128 * 128)
        elif tn > 256:
            tn = max(128, (tn // 2) // 128 * 128)
        elif tm > 256:
            tm = max(sublane, (tm // 2) // sublane * sublane)
        elif w_bufs_for_budget > 2:
            w_bufs_for_budget = 2
        else:
            break

    Bp = _round_up(B, tm)
    D_in_p = _round_up(D_in, tk)
    D_out_p = _round_up(D_out, tn)
    grid_m, grid_n, grid_k = Bp // tm, D_out_p // tn, D_in_p // tk

    w_bufs = max(2, weight_buffers) if grid_k >= 3 else 2
    footprint = _footprint(tm, tn, tk, w_bufs)
    vmem_limit = int(min(max(2 * footprint, 32 * _MIB), 48 * _MIB))

    # --------------------------- pad / pre-cast ---------------------------
    x_p = x
    if (Bp, D_in_p) != (B, D_in):
        x_p = jnp.pad(x, ((0, Bp - B), (0, D_in_p - D_in)))
    w_p = weight
    if (D_in_p, D_out_p) != (D_in, D_out):
        w_p = jnp.pad(weight, ((0, D_in_p - D_in), (0, D_out_p - D_out)))
    b_p = bias if D_out_p == D_out else jnp.pad(bias, (0, D_out_p - D_out))

    if compute_in_bf16:
        # Pre-cast operands in HBM so every tile DMA moves bf16 bytes (the old
        # in-kernel cast paid full f32 DMA on every re-fetched tile).
        x_p = x_p.astype(jnp.bfloat16)
        w_p = w_p.astype(jnp.bfloat16)
    # TODO(synk): v7x-only fp8 weight path (fp8 weights, bf16 activations, f32
    #             accumulation) would halve weight DMA bytes again.
    b2d = b_p.reshape(1, D_out_p).astype(jnp.float32)

    # --------------------------- pallas_call ------------------------------
    if grid_k == 1:
        out_p = pl.pallas_call(
            _mlp_kernel_single_k,
            out_shape=jax.ShapeDtypeStruct((Bp, D_out_p), out_dtype),
            grid=(grid_m, grid_n),
            in_specs=[
                pl.BlockSpec((tm, tk), lambda i, j: (i, 0)),   # x tile
                pl.BlockSpec((tk, tn), lambda i, j: (0, j)),   # weight tile
                pl.BlockSpec((1, tn), lambda i, j: (0, j)),    # bias tile
            ],
            out_specs=pl.BlockSpec((tm, tn), lambda i, j: (i, j)),
            compiler_params=pltpu.CompilerParams(
                dimension_semantics=("parallel", "parallel"),
                vmem_limit_bytes=vmem_limit,
            ),
        )(x_p, w_p, b2d)
    else:
        def _call(n_w_bufs):
            w_idx = lambda i, j, k: (k, j)
            w_spec = pl.BlockSpec((tk, tn), w_idx)
            if n_w_bufs > 2:
                # Deeper pipelining on the weight stream (the only operand that
                # changes every k-step) to hide HBM latency jitter at small batch.
                try:
                    w_spec = pl.BlockSpec((tk, tn), w_idx,
                                          pipeline_mode=pl.Buffered(n_w_bufs))
                except (TypeError, AttributeError):
                    w_spec = pl.BlockSpec((tk, tn), w_idx)
            return pl.pallas_call(
                _mlp_kernel_multi_k,
                out_shape=jax.ShapeDtypeStruct((Bp, D_out_p), out_dtype),
                grid=(grid_m, grid_n, grid_k),
                in_specs=[
                    pl.BlockSpec((tm, tk), lambda i, j, k: (i, k)),  # x tile
                    w_spec,                                          # weight tile
                    pl.BlockSpec((1, tn), lambda i, j, k: (0, j)),   # bias (K-resident)
                ],
                out_specs=pl.BlockSpec((tm, tn), lambda i, j, k: (i, j)),
                scratch_shapes=[pltpu.VMEM((tm, tn), jnp.float32)],
                compiler_params=pltpu.CompilerParams(
                    dimension_semantics=("parallel", "parallel", "arbitrary"),
                    vmem_limit_bytes=vmem_limit,
                ),
            )(x_p, w_p, b2d)

        try:
            out_p = _call(w_bufs)
        except Exception:
            if w_bufs <= 2:
                raise
            out_p = _call(2)  # fall back to default double-buffering

    if (Bp, D_out_p) != (B, D_out):
        out_p = out_p[:B, :D_out]
    return out_p


def mlp_reference(x, weight, bias):
    # Linear -> ReLU -> Dropout(p=0.0) == identity at p=0.
    return jnp.maximum(x @ weight + bias[None, :], 0.0)


if __name__ == "__main__":
    key = jax.random.PRNGKey(0)
    kx, kw, kb, kx2, kw2, kb2 = jax.random.split(key, 6)

    # --- Small shapes consistent with MLP(input_dim, output_dim) ---
    batch, input_dim, output_dim = 8, 32, 32
    x = jax.random.normal(kx, (batch, input_dim), dtype=jnp.float32)
    bound = 1.0 / (input_dim ** 0.5)
    weight = jax.random.uniform(kw, (input_dim, output_dim),
                                minval=-bound, maxval=bound, dtype=jnp.float32)
    bias = jax.random.uniform(kb, (output_dim,),
                              minval=-bound, maxval=bound, dtype=jnp.float32)

    out = jax.block_until_ready(mlp_forward(x, weight, bias))
    ref = mlp_reference(x, weight, bias)
    assert out.shape == (batch, output_dim)
    assert jnp.allclose(out, ref, atol=1e-5, rtol=1e-5)

    # --- Moderate shapes: multi-K accumulator grid, N split, deep weight buffering ---
    B2, D_in2, D_out2 = 256, 1536, 512
    x2 = jax.random.normal(kx2, (B2, D_in2), dtype=jnp.float32)
    bound2 = 1.0 / (D_in2 ** 0.5)
    w2 = jax.random.uniform(kw2, (D_in2, D_out2),
                            minval=-bound2, maxval=bound2, dtype=jnp.float32)
    b2 = jax.random.uniform(kb2, (D_out2,),
                            minval=-bound2, maxval=bound2, dtype=jnp.float32)

    out2 = jax.block_until_ready(mlp_forward(x2, w2, b2))
    ref2 = mlp_reference(x2, w2, b2)
    assert out2.shape == (B2, D_out2)
    assert jnp.allclose(out2, ref2, atol=1e-3, rtol=1e-3)

    # --- bf16 MXU path: pre-cast operands in HBM, f32 accumulation, bf16 output ---
    out3 = jax.block_until_ready(
        mlp_forward(x2, w2, b2, compute_in_bf16=True, out_dtype=jnp.bfloat16))
    assert out3.dtype == jnp.bfloat16
    assert jnp.allclose(out3.astype(jnp.float32), ref2, atol=5e-2, rtol=5e-2)

    print("KERNEL_OK")
</pallas_src>

<mosaic_0001>
module attributes {stable_mosaic.version = 11 : i64} {
  func.func @_mlp_kernel_single_k(%arg0: i32, %arg1: i32, %arg2: memref<8x128xf32, #tpu.memory_space<vmem>>, %arg3: memref<128x128xf32, #tpu.memory_space<vmem>>, %arg4: memref<1x128xf32, #tpu.memory_space<vmem>>, %arg5: memref<8x128xf32, #tpu.memory_space<vmem>>) attributes {dimension_semantics = [#tpu.dimension_semantics<parallel>, #tpu.dimension_semantics<parallel>], iteration_bounds = array<i64: 1, 1>, scalar_prefetch = 0 : i64, scratch_operands = 0 : i64, tpu.core_type = #tpu.core_type<tc>, window_params = [{transform_indices = @transform_0, window_bounds = array<i64: 8, 128>}, {transform_indices = @transform_1, window_bounds = array<i64: 128, 128>}, {transform_indices = @transform_2, window_bounds = array<i64: 1, 128>}, {transform_indices = @transform_3, window_bounds = array<i64: 8, 128>}]} {
    %c0 = arith.constant 0 : index
    %c0_0 = arith.constant 0 : index
    %0 = vector.load %arg2[%c0, %c0_0] : memref<8x128xf32, #tpu.memory_space<vmem>>, vector<8x128xf32>
    %c0_1 = arith.constant 0 : index
    %c0_2 = arith.constant 0 : index
    %1 = vector.load %arg3[%c0_1, %c0_2] : memref<128x128xf32, #tpu.memory_space<vmem>>, vector<128x128xf32>
    %cst = arith.constant dense<0.000000e+00> : vector<8x128xf32>
    %2 = tpu.matmul %0, %1, %cst {dimension_numbers = #tpu.dot_dimension_numbers<[1], [0], [0], [1], [0, 0, 1, 1], [], []>} : vector<8x128xf32>, vector<128x128xf32>, vector<8x128xf32> -> vector<8x128xf32>
    %c0_3 = arith.constant 0 : index
    %c0_4 = arith.constant 0 : index
    %3 = vector.load %arg4[%c0_3, %c0_4] : memref<1x128xf32, #tpu.memory_space<vmem>>, vector<1x128xf32>
    %4 = vector.broadcast %3 : vector<1x128xf32> to vector<8x128xf32>
    %5 = arith.addf %2, %4 : vector<8x128xf32>
    %cst_5 = arith.constant 0.000000e+00 : f32
    %6 = vector.broadcast %cst_5 : f32 to vector<8x128xf32>
    %7 = arith.maximumf %5, %6 : vector<8x128xf32>
    %c0_6 = arith.constant 0 : index
    %c0_7 = arith.constant 0 : index
    %8 = vector.load %arg5[%c0_6, %c0_7] : memref<8x128xf32, #tpu.memory_space<vmem>>, vector<8x128xf32>
    tpu.vector_store %arg5[%c0_6, %c0_7], %7 {strides = array<i32>} : memref<8x128xf32, #tpu.memory_space<vmem>>, vector<8x128xf32>,
    return
  }
  func.func @transform_0(%arg0: i32, %arg1: i32) -> (i32, i32) {
    %c0_i32 = arith.constant 0 : i32
    %c0_i32_0 = arith.constant 0 : i32
    return %arg0, %c0_i32 : i32, i32
  }
  func.func @transform_1(%arg0: i32, %arg1: i32) -> (i32, i32) {
    %c0_i32 = arith.constant 0 : i32
    %c0_i32_0 = arith.constant 0 : i32
    return %c0_i32, %arg1 : i32, i32
  }
  func.func @transform_2(%arg0: i32, %arg1: i32) -> (i32, i32) {
    %c0_i32 = arith.constant 0 : i32
    %c0_i32_0 = arith.constant 0 : i32
    return %c0_i32, %arg1 : i32, i32
  }
  func.func @transform_3(%arg0: i32, %arg1: i32) -> (i32, i32) {
    %c0_i32 = arith.constant 0 : i32
    return %arg0, %arg1 : i32, i32
  }
}

</mosaic_0001>

<bundles_post_ra>
// kernel: tpu_custom_call.1
= control target key start
LH: loop header
LB: loop body
LE: loop exit
PB: predicated region body
PF: predicated region fallthrough
CT: control target
= control target key end

     0   :  { %8 = vsyncpa [#allocation3], 0  ;;  %s227_s0 = inlined_call_operand.hbm [shape: f32[8,128], index: 0, kind: input, shape index: {}]   ;;  %s228_s1 = inlined_call_operand.hbm [shape: f32[128,128], index: 1, kind: input, shape index: {}]   ;;  %s229_s2 = inlined_call_operand.vmem [shape: f32[1,128], index: 2, kind: input, shape index: {}]   ;;  %s230_s3 = inlined_call_operand.hbm [shape: f32[8,128], index: 3, kind: output, shape index: {}]  }
   0x1   :  { %9 = vsyncpa [#allocation6], 0 }
   0x2   :  { %10 = vsyncpa [#allocation4], 0  ;;  %s16_s14 = sshll.u32 %s227_s0, 4  ;;  %s190_s15 = smov [#allocation2]   ;;  %s17_s14 = int_to_ptr.hbm [resolvable:$true] %s16_s14 }
   0x3   :  { %s18_s16 = sshll.u32 %s190_s15, 4  ;;  %s26_s19 = sshll.u32 %s228_s1, 4  ;;  %s19_s16 = int_to_ptr.vmem [resolvable:$true] %s18_s16  ;;  %s27_s19 = int_to_ptr.hbm [resolvable:$true] %s26_s19 }
   0x4   :  { %21 = dma.hbm_to_vmem [thread:$0]  %s17_s14, 128, %s19_s16, [#allocation3]  }
   0x5   :  { %s191_s20 = smov [#allocation5]   ;;  %s192_s22 = smov 128  }
   0x6   :  { %s28_s21 = sshll.u32 %s191_s20, 4  ;;  %s193_s23 = smov 8   ;;  %s29_s21 = int_to_ptr.vmem [resolvable:$true] %s28_s21 }
   0x7   :  { %34 = dma.hbm_to_vmem [thread:$0]  %s27_s19, 2048, %s29_s21, [#allocation6], %s192_s22, %s192_s22, %s193_s23  }
   0x8   :  { %184 = dma.done.wait [#allocation3], 128  }
   0x9   :  { %185 = vsyncadd [#allocation3], 4294967168 }
   0xa   :  { %186 = dma.done.wait [#allocation6], 2048  }
   0xb   :  { %187 = vsyncadd [#allocation6], 4294965248  ;;  %v61_v0 = vld [vmem:[#allocation5 + $0x78] sm:$0xff]  ;;  %v60_v1 = vld [vmem:[#allocation5 + $0x70] sm:$0xff]  ;;  %s194_s24 = smov [#allocation7]   ;;  %s95_s28 = sshll.u32 %s230_s3, 4  ;;  %s96_s28 = int_to_ptr.hbm [resolvable:$true] %s95_s28 }
   0xc   :  { %66 = vmatpush.msra.mxu0 %v61_v0  ;;  %v59_v2 = vld [vmem:[#allocation5 + $0x68] sm:$0xff]  ;;  %v58_v3 = vld [vmem:[#allocation5 + $0x60] sm:$0xff]  ;;  %v57_v4 = vld [vmem:[#allocation5 + $0x58] sm:$0xff]  ;;  %s93_s25 = sshll.u32 %s194_s24, 4  ;;  %s94_s25 = int_to_ptr.vmem [resolvable:$true] %s93_s25 }
   0xd   :  { %v56_v5 = vld [vmem:[#allocation5 + $0x50] sm:$0xff]  ;;  %v55_v6 = vld [vmem:[#allocation5 + $0x48] sm:$0xff]  ;;  %v54_v7 = vld [vmem:[#allocation5 + $0x40] sm:$0xff] }
   0xe   :  { %67 = vmatpush.msra.mxu0 %v60_v1  ;;  %v53_v8 = vld [vmem:[#allocation5 + $0x38] sm:$0xff]  ;;  %v52_v9 = vld [vmem:[#allocation5 + $0x30] sm:$0xff]  ;;  %v51_v10 = vld [vmem:[#allocation5 + $0x28] sm:$0xff] }
   0xf   :  { %v50_v11 = vld [vmem:[#allocation5 + $0x20] sm:$0xff]  ;;  %v49_v12 = vld [vmem:[#allocation5 + $0x18] sm:$0xff]  ;;  %v48_v13 = vld [vmem:[#allocation5 + $0x10] sm:$0xff] }
  0x10   :  { %68 = vmatpush.msra.mxu0 %v59_v2  ;;  %v47_v14 = vld [vmem:[#allocation5 + $0x8] sm:$0xff]  ;;  %v46_v15 = vld [vmem:[#allocation5] sm:$0xff]  ;;  %v45_v16 = vld [vmem:[#allocation2] sm:$0xff] }
  0x11   :  { %v111_v17 = vld [vmem:[%s229_s2] ss:$0 sm:$0xff] }
  0x12   :  { %69 = vmatpush.msra.mxu0 %v58_v3 }
  0x14   :  { %70 = vmatpush.msra.mxu0 %v57_v4 }
  0x16   :  { %71 = vmatpush.msra.mxu0 %v56_v5 }
  0x18   :  { %72 = vmatpush.msra.mxu0 %v55_v6 }
  0x1a   :  { %73 = vmatpush.msra.mxu0 %v54_v7 }
  0x1c   :  { %74 = vmatpush.msra.mxu0 %v53_v8 }
  0x1e   :  { %75 = vmatpush.msra.mxu0 %v52_v9 }
  0x20   :  { %76 = vmatpush.msra.mxu0 %v51_v10 }
  0x22   :  { %77 = vmatpush.msra.mxu0 %v50_v11 }
  0x24   :  { %78 = vmatpush.msra.mxu0 %v49_v12 }
  0x26   :  { %79 = vmatpush.msra.mxu0 %v48_v13 }
  0x28   :  { %80 = vmatpush.msra.mxu0 %v47_v14 }
  0x2a   :  { %81 = vmatpush.msra.mxu0 %v46_v15 }
  0x2b   :  { %82 = vmatmul.f32.vlgmr.msra.gmra.mxu0 %v45_v16 }
  0xa8   :  { %v83_v18 = vpop.f32.mrf.mxu0 }
  0xa9   :  { %v84_v19 = vadd.f32 %v111_v17, %v83_v18 }
  0xab   :  { %v86_v20 = vmax.f32 %v84_v19, 0.0 }
  0xad   :  { %87 = vst [vmem:[#allocation7] sm:$0xff] %v86_v20 }
  0xae   :  { %98 = dma.vmem_to_hbm [thread:$0]  %s94_s25, 128, %s96_s28, [#allocation4]  }
  0xaf   :  { %188 = dma.done.wait [#allocation4], 128  }
  0xb0   :  { %189 = vsyncadd [#allocation4], 4294967168 }
  0xb1   :  { %103 = vsyncpa [#allocation3], 1 }
  0xb2   :  { %104 = vsyncpa [#allocation6], 1 }
  0xb3   :  { %105 = vsyncpa [#allocation4], 1 }

</bundles_post_ra>
